<compile_context>
chip_gen: v6e
topology: v6e:2x2x1
jax: 0.10.0
libtpu: 0.0.40
codegen_flags: <defaults>
</compile_context>

<pallas_src>
import functools

import jax
import jax.numpy as jnp
from jax import lax
from jax.experimental import pallas as pl
from jax.experimental.pallas import tpu as pltpu


def _label_smooth_kernel(x_ref, t_ref, out_ref, *, conf, smooth_eps,
                         n_rows, tile_rows):
    # x_ref: (tn, C) native dtype, t_ref: (tn, 1) int32, out_ref: (8, 128) f32.
    i = pl.program_id(0)

    x = x_ref[...].astype(jnp.float32)                        # (tn, C)
    t = t_ref[...]                                            # (tn, 1) int32
    c = x.shape[-1]
    inv_c = 1.0 / c

    # Per-row max + logsumexp (log_softmax is never materialized).
    m = jnp.max(x, axis=-1, keepdims=True)                    # (tn, 1)
    lse = jnp.log(jnp.sum(jnp.exp(x - m), axis=-1, keepdims=True))

    # Fused gather + mean:  conf*x_t + (eps/C)*sum(x)
    #   == sum_j where(j == t, conf + eps/C, eps/C) * x_j
    col = lax.broadcasted_iota(jnp.int32, (1, c), 1)          # (1, C), broadcasts vs t
    w = jnp.where(col == t, conf + smooth_eps * inv_c, smooth_eps * inv_c)
    wsum = jnp.sum(w * x, axis=-1, keepdims=True)             # (tn, 1)

    # conf*nll + eps*smooth  ==  (m + lse) - [conf*x_t + eps*sum(x)/C]
    per_example = (m + lse) - wsum

    # Mask rows past the real batch size (partial last block: no wrapper pad).
    row = lax.broadcasted_iota(jnp.int32, per_example.shape, 0) + i * tile_rows
    per_example = jnp.where(row < n_rows, per_example, 0.0)

    out_ref[...] = jnp.full((8, 128), jnp.sum(per_example), dtype=jnp.float32)


def label_smooth_loss(x, target, smooth_eps=0.1, max_block_rows=None):
    """x: (N, C) float (any dtype), target: (N,) int -> scalar float32 loss."""
    n, c = x.shape
    conf = 1.0 - smooth_eps
    itemsize = x.dtype.itemsize

    # Sublane packing of the native dtype: 8 (f32), 16 (bf16), 32 (int8/fp8).
    mult = max(8, 32 // max(itemsize, 1))

    # VMEM budget per tile: double-buffered native input + ~3 f32 tile temps
    # (f32 cast, exp(x-m), weighted product).  ~16 MiB keeps headroom on every
    # generation with the 32 MiB scoped limit set below.
    bytes_per_row = c * (2 * itemsize + 3 * 4)
    vmem_budget = 16 * 1024 * 1024
    tn = max(1, vmem_budget // max(bytes_per_row, 1))
    tn = min(tn, 2048)
    if max_block_rows is not None:
        tn = min(tn, int(max_block_rows))
    n_ceil = ((n + mult - 1) // mult) * mult
    tn = min(tn, n_ceil)                      # don't over-allocate for tiny N
    tn = max(mult, (tn // mult) * mult)       # dtype sublane multiple

    num_tiles = -(-n // tn)                   # ceil(N / tn), no wrapper pad

    t2 = target.astype(jnp.int32).reshape(n, 1)

    kernel = functools.partial(
        _label_smooth_kernel,
        conf=float(conf),
        smooth_eps=float(smooth_eps),
        n_rows=int(n),
        tile_rows=int(tn),
    )

    out = pl.pallas_call(
        kernel,
        out_shape=jax.ShapeDtypeStruct((num_tiles * 8, 128), jnp.float32),
        grid=(num_tiles,),
        in_specs=[
            pl.BlockSpec((tn, c), lambda i: (i, 0)),   # x rows, full C
            pl.BlockSpec((tn, 1), lambda i: (i, 0)),   # targets
        ],
        out_specs=pl.BlockSpec((8, 128), lambda i: (i, 0)),
        compiler_params=pltpu.CompilerParams(
            dimension_semantics=("parallel",),
            vmem_limit_bytes=32 * 1024 * 1024,
        ),
        cost_estimate=pl.CostEstimate(
            flops=int(6 * n * c),
            transcendentals=int(n * c),
            bytes_accessed=int(n * c * itemsize + n * 4 + num_tiles * 8 * 128 * 4),
        ),
    )(x, t2)

    partials = out.reshape(num_tiles, 8, 128)[:, 0, 0]    # (num_tiles,)
    return jnp.sum(partials) / n


def _reference(x, target, smooth_eps=0.1):
    conf = 1.0 - smooth_eps
    log_sm = jax.nn.log_softmax(x.astype(jnp.float32), axis=-1)
    nll = -jnp.take_along_axis(log_sm, target[:, None], axis=-1)[:, 0]
    smooth = -jnp.mean(log_sm, axis=-1)
    return jnp.mean(conf * nll + smooth_eps * smooth)


if __name__ == "__main__":
    key = jax.random.PRNGKey(0)
    kx, kt = jax.random.split(key)

    smooth_eps = 0.1

    # Small shapes consistent with the module's forward: (batch, num_classes).
    N, C = 8, 32
    x = jax.random.normal(kx, (N, C), dtype=jnp.float32)
    target = jax.random.randint(kt, (N,), 0, C, dtype=jnp.int32)

    loss = jax.block_until_ready(label_smooth_loss(x, target, smooth_eps=smooth_eps))
    ref = _reference(x, target, smooth_eps=smooth_eps)
    assert jnp.allclose(loss, ref, atol=1e-5, rtol=1e-5), (loss, ref)

    # Multi-tile, non-multiple-of-tile batch: exercises the no-pad partial
    # last block + in-kernel row-mask accumulation path.
    N2, C2 = 1000, 256
    x2 = jax.random.normal(kx, (N2, C2), dtype=jnp.float32)
    t2 = jax.random.randint(kt, (N2,), 0, C2, dtype=jnp.int32)
    loss2 = jax.block_until_ready(
        label_smooth_loss(x2, t2, smooth_eps=smooth_eps, max_block_rows=128))
    ref2 = _reference(x2, t2, smooth_eps=smooth_eps)
    assert jnp.allclose(loss2, ref2, atol=1e-5, rtol=1e-5), (loss2, ref2)

    # bf16 input: exercises the 16-row sublane-packing tile rounding.
    N3, C3 = 500, 128
    x3 = jax.random.normal(kx, (N3, C3), dtype=jnp.float32).astype(jnp.bfloat16)
    t3 = jax.random.randint(kt, (N3,), 0, C3, dtype=jnp.int32)
    loss3 = jax.block_until_ready(
        label_smooth_loss(x3, t3, smooth_eps=smooth_eps, max_block_rows=64))
    ref3 = _reference(x3, t3, smooth_eps=smooth_eps)
    assert jnp.allclose(loss3, ref3, atol=1e-4, rtol=1e-4), (loss3, ref3)

    print("KERNEL_OK")
</pallas_src>

<mosaic_0001>
module attributes {stable_mosaic.version = 11 : i64} {
  func.func @_label_smooth_kernel(%arg0: i32, %arg1: memref<8x32xf32, #tpu.memory_space<vmem>>, %arg2: memref<8x1xi32, #tpu.memory_space<vmem>>, %arg3: memref<8x128xf32, #tpu.memory_space<vmem>>) attributes {dimension_semantics = [#tpu.dimension_semantics<parallel>], iteration_bounds = array<i64: 1>, scalar_prefetch = 0 : i64, scratch_operands = 0 : i64, tpu.core_type = #tpu.core_type<tc>, window_params = [{transform_indices = @transform_0, window_bounds = array<i64: 8, 32>}, {transform_indices = @transform_1, window_bounds = array<i64: 8, 1>}, {transform_indices = @transform_2, window_bounds = array<i64: 8, 128>}]} {
    %c0 = arith.constant 0 : index
    %c0_0 = arith.constant 0 : index
    %0 = vector.load %arg1[%c0, %c0_0] : memref<8x32xf32, #tpu.memory_space<vmem>>, vector<8x32xf32>
    %c0_1 = arith.constant 0 : index
    %c0_2 = arith.constant 0 : index
    %1 = vector.load %arg2[%c0_1, %c0_2] : memref<8x1xi32, #tpu.memory_space<vmem>>, vector<8x1xi32>
    %cst = arith.constant dense<0xFF800000> : vector<8xf32>
    %2 = vector.multi_reduction <maximumf>, %0, %cst [1] : vector<8x32xf32> to vector<8xf32>
    %3 = vector.shape_cast %2 : vector<8xf32> to vector<8x1xf32>
    %4 = vector.broadcast %3 : vector<8x1xf32> to vector<8x32xf32>
    %5 = arith.subf %0, %4 : vector<8x32xf32>
    %6 = math.exp %5 : vector<8x32xf32>
    %cst_3 = arith.constant dense<0.000000e+00> : vector<8xf32>
    %7 = vector.multi_reduction <add>, %6, %cst_3 [1] : vector<8x32xf32> to vector<8xf32>
    %8 = vector.shape_cast %7 : vector<8xf32> to vector<8x1xf32>
    %9 = math.log %8 : vector<8x1xf32>
    %10 = tpu.iota {dimensions = array<i32: 1>} : vector<1x32xi32>
    %11 = vector.broadcast %10 : vector<1x32xi32> to vector<8x32xi32>
    %12 = vector.broadcast %1 : vector<8x1xi32> to vector<8x32xi32>
    %13 = arith.cmpi eq, %11, %12 : vector<8x32xi32>
    %cst_4 = arith.constant 0.903124988 : f32
    %cst_5 = arith.constant 3.125000e-03 : f32
    %14 = vector.broadcast %cst_4 : f32 to vector<8x32xf32>
    %15 = vector.broadcast %cst_5 : f32 to vector<8x32xf32>
    %16 = arith.select %13, %14, %15 : vector<8x32xi1>, vector<8x32xf32>
    %17 = arith.mulf %16, %0 : vector<8x32xf32>
    %cst_6 = arith.constant dense<0.000000e+00> : vector<8xf32>
    %18 = vector.multi_reduction <add>, %17, %cst_6 [1] : vector<8x32xf32> to vector<8xf32>
    %19 = vector.shape_cast %18 : vector<8xf32> to vector<8x1xf32>
    %20 = arith.addf %3, %9 : vector<8x1xf32>
    %21 = arith.subf %20, %19 : vector<8x1xf32>
    %22 = tpu.iota {dimensions = array<i32: 0>} : vector<8x1xi32>
    %c8_i32 = arith.constant 8 : i32
    %23 = arith.muli %arg0, %c8_i32 : i32
    %24 = vector.broadcast %23 : i32 to vector<8x1xi32>
    %25 = arith.addi %22, %24 : vector<8x1xi32>
    %c8_i32_7 = arith.constant 8 : i32
    %26 = vector.broadcast %c8_i32_7 : i32 to vector<8x1xi32>
    %27 = arith.cmpi slt, %25, %26 : vector<8x1xi32>
    %cst_8 = arith.constant 0.000000e+00 : f32
    %28 = vector.broadcast %cst_8 : f32 to vector<8x1xf32>
    %29 = arith.select %27, %21, %28 : vector<8x1xi1>, vector<8x1xf32>
    %30 = vector.shape_cast %29 : vector<8x1xf32> to vector<1x8x1xf32>
    %cst_9 = arith.constant dense<0.000000e+00> : vector<1xf32>
    %31 = vector.multi_reduction <add>, %30, %cst_9 [1, 2] : vector<1x8x1xf32> to vector<1xf32>
    %32 = vector.shape_cast %31 : vector<1xf32> to vector<1x1x1xf32>
    %33 = vector.extract %32[0, 0, 0] : f32 from vector<1x1x1xf32>
    %34 = vector.broadcast %33 : f32 to vector<8x128xf32>
    %c0_10 = arith.constant 0 : index
    %c0_11 = arith.constant 0 : index
    %35 = vector.load %arg3[%c0_10, %c0_11] : memref<8x128xf32, #tpu.memory_space<vmem>>, vector<8x128xf32>
    tpu.vector_store %arg3[%c0_10, %c0_11], %34 {strides = array<i32>} : memref<8x128xf32, #tpu.memory_space<vmem>>, vector<8x128xf32>,
    return
  }
  func.func @transform_0(%arg0: i32) -> (i32, i32) {
    %c0_i32 = arith.constant 0 : i32
    %c0_i32_0 = arith.constant 0 : i32
    return %arg0, %c0_i32 : i32, i32
  }
  func.func @transform_1(%arg0: i32) -> (i32, i32) {
    %c0_i32 = arith.constant 0 : i32
    %c0_i32_0 = arith.constant 0 : i32
    return %arg0, %c0_i32 : i32, i32
  }
  func.func @transform_2(%arg0: i32) -> (i32, i32) {
    %c0_i32 = arith.constant 0 : i32
    %c0_i32_0 = arith.constant 0 : i32
    return %arg0, %c0_i32 : i32, i32
  }
}

</mosaic_0001>

<bundles_post_ra>
// kernel: tpu_custom_call.1
= control target key start
LH: loop header
LB: loop body
LE: loop exit
PB: predicated region body
PF: predicated region fallthrough
CT: control target
= control target key end

     0   :  { %vm14_vm0 = vcmask 261120   ;;  %s135_s0 = inlined_call_operand.vmem [shape: f32[8,32], index: 0, kind: input, shape index: {}]   ;;  %s136_s1 = inlined_call_operand.vmem [shape: s32[8,1], index: 1, kind: input, shape index: {}]   ;;  %s137_s2 = inlined_call_operand.hbm [shape: f32[8,128], index: 2, kind: output, shape index: {}]  }
   0x1   :  { %v12_v0 = vld [vmem:[%s135_s0] sm:$0xff] }
   0x2   :  { %7 = vsyncpa [#allocation3], 0  ;;  %v15_v1 = vsel %vm14_vm0, %v12_v0, -inf  ;;  %v105_v2 = vmov 0   ;;  %v13_v3 = vld [vmem:[%s136_s1] sm:$0xff]  ;;  %v26_v7 = vlaneseq  ;;  %vm46_vm2 = vcmask 7168  }
   0x3   :  { %78 = vset.pattern.permute.xlu0 %v105_v2  ;;  %v106_v10 = vmov 0.003125   ;;  %s107_s0 = smov [#allocation2]  }
   0x4   :  { %16 = vmax.xlane.f32.xlu0 %v15_v1  ;;  %v27_v8 = vand.u32 127, %v26_v7  ;;  %s65_s1 = sshll.u32 %s107_s0, 4  ;;  %s66_s1 = int_to_ptr.vmem [resolvable:$true] %s65_s1 }
   0x5   :  { %s83_s14 = scalar_lea.vmem %s66_s1, 128  ;;  %p88_p1 = scmp.lt.s32.totalorder %s66_s1, %s66_s1 }
   0x6   :  { %p84_p0 = scmp.ne.s32.totalorder %s66_s1, %s83_s14  ;;  %p89_p2 = scmp.lt.s32.totalorder %s83_s14, %s83_s14 }
   0x8   :  { %p90_p3 = por %p89_p2, %p88_p1 }
   0xa   :  { %p91_p4 = pnand %p90_p3, %p84_p0 }
  0x1a   :  { %29 = vperm.xlu0 %78, %v13_v3  }
  0x8d   :  { %v17_v4 = vpop.xlane.xlu0 %16 }
  0x8e   :  { %v18_v5 = vsub.f32 %v12_v0, %v17_v4 }
  0x90   :  { %v19_v6 = vmul.f32 1.442695, %v18_v5 }
  0x92   :  { %79 = vpow2.f32 %v19_v6 }
  0x95   :  { %v30_v9 = vpop.permute.xlu0 %29 }
  0x96   :  { %vm31_vm1 = vcmp.eq.s32.totalorder %v27_v8, %v30_v9 }
  0x97   :  { %v32_v11 = vsel %vm31_vm1, 0.903125, %v106_v10 }
  0x98   :  { %v33_v12 = vmul.f32 %v32_v11, %v12_v0 }
  0x9a   :  { %v34_v15 = vsel %vm14_vm0, %v33_v12, 0.0 }
  0x9f   :  { %v80_v13 = vpop.eup %79 }
  0xa0   :  { %v21_v14 = vsel %vm14_vm0, %v80_v13, 0.0 }
  0xa1   :  { %22 = vadd.xlane.f32.xlu1 %v21_v14 }
  0xa5   :  { %35 = vadd.xlane.f32.xlu1 %v34_v15 }
 0x12a   :  { %v23_v16 = vpop.xlane.xlu1 %22 }
 0x12b   :  { %81 = vlog2.f32 %v23_v16 }
 0x12e   :  { %v36_v19 = vpop.xlane.xlu1 %35 }
 0x138   :  { %v82_v17 = vpop.eup %81 }
 0x139   :  { %v25_v18 = vmul.f32 0.6931472, %v82_v17 }
 0x13b   :  { %v37_v20 = vadd.f32 %v25_v18, %v17_v4 }
 0x13d   :  { %v38_v21 = vsub.f32 %v37_v20, %v36_v19 }
 0x13f   :  { %v47_v22 = vsel %vm46_vm2, %v38_v21, 0.0 }
 0x140   :  { %48 = vadd.xlane.f32.xlu1 %v47_v22 }
 0x1c9   :  { %v49_v23 = vpop.xlane.xlu1 %48 }
 0x1ca   :  { %v50_v24 = vrot.slane %v49_v23, 4 }
 0x1cc   :  { %v51_v25 = vadd.f32 %v50_v24, %v49_v23 }
 0x1ce   :  { %v52_v26 = vrot.slane %v51_v25, 2 }
 0x1d0   :  { %v53_v27 = vadd.f32 %v52_v26, %v51_v25 }
 0x1d2   :  { %v54_v28 = vrot.slane %v53_v27, 1 }
 0x1d4   :  { %v55_v29 = vadd.f32 %v54_v28, %v53_v27 }
 0x1d6   :  { %73 = vpush %v55_v29 }
 0x207   :  { %s74_s13 = spop %73 }
 0x208   :  { %v57_v30 = vstv %s74_s13 }
 0x209   :  { %58 = vst [vmem:[#allocation2] sm:$0xff] %v57_v30 }
 0x20a   :  { %94 = shalt.err (!%p91_p4)
}
 0x20b   :  { %68 = dma.vmem_to_hbm [thread:$0]  %s66_s1, 128, %s137_s2, [#allocation3]  }
 0x20c   :  { %103 = dma.done.wait [#allocation3], 128  }
 0x20d   :  { %104 = vsyncadd [#allocation3], 4294967168 }
 0x20e   :  { %72 = vsyncpa [#allocation3], 1 }

</bundles_post_ra>
